<compile_context>
chip_gen: v6e
topology: v6e:2x2x1
jax: 0.10.0
libtpu: 0.0.40
codegen_flags: <defaults>
</compile_context>

<pallas_src>
import jax
import jax.numpy as jnp
from jax.experimental import pallas as pl
from jax.experimental.pallas import tpu as pltpu


def _blend_kernel(x_ref, y_ref, wx_ref, o_ref):
    # x/y blocks: (TR, D); weight block: (TR, 1) broadcast across the lane axis.
    wx = wx_ref[...]
    wy = jnp.asarray(1.0, dtype=wx.dtype) - wx          # exact for 0, 0.5, 1
    o_ref[...] = x_ref[...] * wx + y_ref[...] * wy


def _avg_kernel(x_ref, y_ref, o_ref):
    half = jnp.asarray(0.5, dtype=x_ref.dtype)
    o_ref[...] = (x_ref[...] + y_ref[...]) * half


def _row_tile(n_rows, hidden, itemsize, target_bytes=4 * 1024 * 1024):
    """Row-tile size: multiple of 8, ~target_bytes per (TR, D) input block,
    and at least 2 grid tiles whenever n_rows > 8 (so v7x's 2 TCs both work)."""
    tr = max(8, (target_bytes // max(1, hidden * itemsize)) // 8 * 8)
    rows8 = ((n_rows + 7) // 8) * 8
    tr = min(tr, rows8)
    if n_rows > 8 and int(pl.cdiv(n_rows, tr)) < 2:
        half = (((n_rows + 1) // 2) + 7) // 8 * 8
        tr = max(8, min(tr, half))
    return int(tr)


def random_erase_forward(x, y, drop_prob, *, training=True, seed=0):
    """Pallas-TPU equivalent of random_erase.forward(x, y)."""
    assert x.ndim == y.ndim == 3
    assert x.shape == y.shape
    if drop_prob < 0.0 or drop_prob > 1.0:
        raise ValueError(
            f"drop probability has to be between 0 and 1, but got {drop_prob}")

    L, B, D = x.shape
    R = L * B
    itemsize = jnp.dtype(x.dtype).itemsize
    TR = _row_tile(R, D, itemsize)
    n_tiles = int(pl.cdiv(R, TR))          # ragged last block: no padding, no slice

    x2 = x.reshape(R, D)
    y2 = y.reshape(R, D)

    data_spec = pl.BlockSpec((TR, D), lambda i: (i, 0))
    comp = pltpu.CompilerParams(
        dimension_semantics=("parallel",),
        vmem_limit_bytes=40 * 1024 * 1024,
    )

    if (not training) or drop_prob == 0.0:
        out = pl.pallas_call(
            _avg_kernel,
            out_shape=jax.ShapeDtypeStruct((R, D), x.dtype),
            grid=(n_tiles,),
            in_specs=[data_spec, data_spec],
            out_specs=data_spec,
            compiler_params=comp,
        )(x2, y2)
        return out.reshape(L, B, D)

    survival_rate = 1.0 - drop_prob
    key = jax.random.PRNGKey(seed)
    kpos, ksrc = jax.random.split(key)
    # Per-(layer, batch)-row Bernoulli masks, drawn at (R, 1) so the realized
    # pattern is independent of the tile size chosen below.
    pos = jax.random.bernoulli(kpos, p=survival_rate, shape=(R, 1))
    src = jax.random.bernoulli(ksrc, p=0.5, shape=(R, 1))
    # pos -> average ; ~pos & src -> x ; ~pos & ~src -> y.  wy = 1 - wx.
    wx = jnp.where(pos, 0.5, jnp.where(src, 1.0, 0.0)).astype(x.dtype)

    w_spec = pl.BlockSpec((TR, 1), lambda i: (i, 0))
    out = pl.pallas_call(
        _blend_kernel,
        out_shape=jax.ShapeDtypeStruct((R, D), x.dtype),
        grid=(n_tiles,),
        in_specs=[data_spec, data_spec, w_spec],
        out_specs=data_spec,
        compiler_params=comp,
    )(x2, y2, wx)
    return out.reshape(L, B, D)


if __name__ == "__main__":
    key = jax.random.PRNGKey(0)
    kx, ky = jax.random.split(key)

    # (layer, batch, hidden) — small shapes consistent with the module's x.shape
    L, B, D = 2, 8, 128
    x = jax.random.normal(kx, (L, B, D), dtype=jnp.float32)
    y = jax.random.normal(ky, (L, B, D), dtype=jnp.float32)

    out_train = random_erase_forward(x, y, drop_prob=0.3, training=True, seed=1234)
    out_eval = random_erase_forward(x, y, drop_prob=0.3, training=False)
    out_p1 = random_erase_forward(x, y, drop_prob=1.0, training=True, seed=7)
    jax.block_until_ready((out_train, out_eval, out_p1))

    # eval / drop_prob==0 path must be the exact average
    assert jnp.allclose(out_eval, (x + y) * 0.5, atol=1e-6)

    # training path: every (layer, batch) row must be exactly x, y, or (x+y)/2
    cand = jnp.stack([x, y, (x + y) * 0.5], axis=0)            # (3, L, B, D)
    match = jnp.any(jnp.all(jnp.abs(cand - out_train[None]) < 1e-5, axis=-1), axis=0)
    assert bool(jnp.all(match))

    # drop_prob == 1.0 in training: every row is exactly x or y (never the average)
    cand2 = jnp.stack([x, y], axis=0)                          # (2, L, B, D)
    match2 = jnp.any(jnp.all(jnp.abs(cand2 - out_p1[None]) < 1e-5, axis=-1), axis=0)
    assert bool(jnp.all(match2))

    print("KERNEL_OK")
</pallas_src>

<mosaic_0001>
module attributes {stable_mosaic.version = 11 : i64} {
  func.func @_blend_kernel(%arg0: i32, %arg1: memref<8x128xf32, #tpu.memory_space<vmem>>, %arg2: memref<8x128xf32, #tpu.memory_space<vmem>>, %arg3: memref<8x1xf32, #tpu.memory_space<vmem>>, %arg4: memref<8x128xf32, #tpu.memory_space<vmem>>) attributes {dimension_semantics = [#tpu.dimension_semantics<parallel>], iteration_bounds = array<i64: 2>, scalar_prefetch = 0 : i64, scratch_operands = 0 : i64, tpu.core_type = #tpu.core_type<tc>, window_params = [{transform_indices = @transform_0, window_bounds = array<i64: 8, 128>}, {transform_indices = @transform_1, window_bounds = array<i64: 8, 128>}, {transform_indices = @transform_2, window_bounds = array<i64: 8, 1>}, {transform_indices = @transform_3, window_bounds = array<i64: 8, 128>}]} {
    %c0 = arith.constant 0 : index
    %c0_0 = arith.constant 0 : index
    %0 = vector.load %arg3[%c0, %c0_0] : memref<8x1xf32, #tpu.memory_space<vmem>>, vector<8x1xf32>
    %cst = arith.constant 1.000000e+00 : f32
    %1 = vector.broadcast %cst : f32 to vector<8x1xf32>
    %2 = arith.subf %1, %0 : vector<8x1xf32>
    %c0_1 = arith.constant 0 : index
    %c0_2 = arith.constant 0 : index
    %3 = vector.load %arg1[%c0_1, %c0_2] : memref<8x128xf32, #tpu.memory_space<vmem>>, vector<8x128xf32>
    %4 = vector.broadcast %0 : vector<8x1xf32> to vector<8x128xf32>
    %5 = arith.mulf %3, %4 : vector<8x128xf32>
    %c0_3 = arith.constant 0 : index
    %c0_4 = arith.constant 0 : index
    %6 = vector.load %arg2[%c0_3, %c0_4] : memref<8x128xf32, #tpu.memory_space<vmem>>, vector<8x128xf32>
    %7 = vector.broadcast %2 : vector<8x1xf32> to vector<8x128xf32>
    %8 = arith.mulf %6, %7 : vector<8x128xf32>
    %9 = arith.addf %5, %8 : vector<8x128xf32>
    %c0_5 = arith.constant 0 : index
    %c0_6 = arith.constant 0 : index
    %10 = vector.load %arg4[%c0_5, %c0_6] : memref<8x128xf32, #tpu.memory_space<vmem>>, vector<8x128xf32>
    tpu.vector_store %arg4[%c0_5, %c0_6], %9 {strides = array<i32>} : memref<8x128xf32, #tpu.memory_space<vmem>>, vector<8x128xf32>,
    return
  }
  func.func @transform_0(%arg0: i32) -> (i32, i32) {
    %c0_i32 = arith.constant 0 : i32
    %c0_i32_0 = arith.constant 0 : i32
    return %arg0, %c0_i32 : i32, i32
  }
  func.func @transform_1(%arg0: i32) -> (i32, i32) {
    %c0_i32 = arith.constant 0 : i32
    %c0_i32_0 = arith.constant 0 : i32
    return %arg0, %c0_i32 : i32, i32
  }
  func.func @transform_2(%arg0: i32) -> (i32, i32) {
    %c0_i32 = arith.constant 0 : i32
    %c0_i32_0 = arith.constant 0 : i32
    return %arg0, %c0_i32 : i32, i32
  }
  func.func @transform_3(%arg0: i32) -> (i32, i32) {
    %c0_i32 = arith.constant 0 : i32
    %c0_i32_0 = arith.constant 0 : i32
    return %arg0, %c0_i32 : i32, i32
  }
}

</mosaic_0001>

<bundles_post_ra>
// kernel: tpu_custom_call.1
= control target key start
LH: loop header
LB: loop body
LE: loop exit
PB: predicated region body
PF: predicated region fallthrough
CT: control target
= control target key end

     0   :  { %8 = vsyncpa [#allocation3], 0  ;;  %s674_s0 = inlined_call_operand.vmem [shape: f32[16,128], index: 0, kind: input, shape index: {}]   ;;  %s675_s1 = inlined_call_operand.hbm [shape: f32[16,128], index: 1, kind: input, shape index: {}]   ;;  %s676_s2 = inlined_call_operand.vmem [shape: f32[16,1], index: 2, kind: input, shape index: {}]   ;;  %s677_s3 = inlined_call_operand.hbm [shape: f32[16,128], index: 3, kind: output, shape index: {}]  }
   0x1   :  { %10 = vsyncpa [#allocation3 + $0x1], 0 }
   0x2   :  { %11 = vsyncpa [#allocation4], 0 }
   0x3   :  { %13 = vsyncpa [#allocation4 + $0x1], 0  ;;  %s525_s12 = smov 0   ;;  %s527_s13 = smov 0  }
   0x4   :  { %s529_s14 = smov 0   ;;  %s531_s15 = smov 0  }
   0x5 LB: > { %s546_s16 = sadd.s32 4294967295, %s500_s15   ;;  %s346_s17 = sadd.s32 4294967294, %s500_s15   ;;  %s500_s15 = sphi %s531_s15, %s694_s15   ;;  %s496_s14 = sphi %s529_s14, %s693_s14   ;;  %s492_s13 = sphi %s527_s13, %s692_s13   ;;  %s488_s12 = sphi %s525_s12, %s691_s12  }
   0x6   : > { %s550_s18 = sadd.s32 1, %s500_s15   ;;  %s52_s19 = sadd.s32 1, %s496_s14 }
   0x7   : > { %s49_s20 = ssub.s32 %s500_s15, %s550_s18  ;;  %p59_p0 = scmp.ne.s32.totalorder %s496_s14, %s492_s13 }
   0x8   : > { %p50_p1 = scmp.eq.s32.totalorder %s49_s20, 0  ;;  %p60_p2 = scmp.eq.s32.totalorder %s500_s15, 0 }
   0x9   : > { %p65_p3 = scmp.ne.s32.totalorder %s492_s13, %s488_s12  ;;  %p66_p4 = scmp.eq.s32.totalorder %s546_s16, 0 }
   0xa   : > { %s562_s21 = scalar_select %p50_p1, %s496_s14, %s52_s19  }
   0xb   : > { %p564_p5 = por %p60_p2, %p59_p0  ;;  %p568_p6 = por %p66_p4, %p65_p3 }
   0xc   : > { %p115_p7 = scmp.eq.s32.totalorder %s546_s16, 1  ;;  %p121_p8 = scmp.eq.s32.totalorder %s346_s17, 1 }
   0xd   : > { %s681_s23 = scalar_select %p568_p6, 1, 0 }
   0xe   : > { %p372_p10 = scmp.lt.s32.totalorder %s500_s15, 2  ;;  %p575_p11 = por %p115_p7, %p59_p0 }
   0xf   : > { %p579_p12 = por %p121_p8, %p65_p3  ;;  %s148_s26 = sand.u32 1, %s496_s14  }
  0x10   : > { %s682_s24 = scalar_select %p575_p11, 1, 0 }
  0x11   : > { %s683_s25 = scalar_select %p579_p12, 1, 0 }
  0x12   : > { %s350_s27 = sshll.u32 %s500_s15, 7  ;;  %s349_s28 = sshll.u32 %s148_s26, 3 }
  0x13   : > { %s588_s4 = scalar_lea.hbm %s675_s1, %s350_s27  ;;  %s152_s5 = scalar_lea.vmem [#allocation2], %s349_s28 }
  0x14   : > { %s159_s6 = sshll.u32 %s152_s5, 4  ;;  %p592_p13 = pnand %p372_p10, %p564_p5  ;;  %s596_s6 = int_to_ptr.vmem [resolvable:$true] %s159_s6 }
  0x15   : > { %s149_s8 = scalar_lea.sflag [#allocation3], %s148_s26  ;;  %s408_s9 = scalar_lea.hbm %s588_s4, 128 }
  0x16   : > { %p409_p2 = scmp.ne.s32.totalorder %s588_s4, %s408_s9  ;;  %p410_p3 = pneg %p592_p13 }
  0x17   : > { %s413_s17 = scalar_lea.hbm %s675_s1, 256  ;;  %p414_p5 = scmp.lt.s32.totalorder %s588_s4, %s675_s1 }
  0x18   : > { %p411_p4 = pnand %p410_p3, %p409_p2  ;;  %p415_p8 = scmp.lt.s32.totalorder %s413_s17, %s408_s9 }
  0x1a   : > { %p412_p7 = pneg %p411_p4  ;;  %p416_p10 = por %p415_p8, %p414_p5 }
  0x1c   : > { %p417_p9 = pnand %p416_p10, %p412_p7 }
  0x1e   : > { %420 = shalt.err (!%p417_p9)
}
  0x1f   : > { %s421_s22 = scalar_lea.vmem %s596_s6, 128  ;;  %s502_s26 = smov [#allocation2]  }
  0x20   : > { %p422_p0 = scmp.ne.s32.totalorder %s596_s6, %s421_s22  ;;  %s426_s27 = sshll.u32 %s502_s26, 4  ;;  %s427_s27 = int_to_ptr.vmem [resolvable:$false] %s426_s27 }
  0x21   : > { %s428_s28 = scalar_lea.vmem %s427_s27, 256  ;;  %p429_p4 = scmp.lt.s32.totalorder %s596_s6, %s427_s27 }
  0x22   : > { %p424_p1 = pnand %p422_p0, %p410_p3  ;;  %p430_p12 = scmp.lt.s32.totalorder %s428_s28, %s421_s22 }
  0x24   : > { %p425_p2 = pneg %p424_p1  ;;  %p431_p11 = por %p430_p12, %p429_p4 }
  0x26   : > { %p432_p6 = pnand %p431_p11, %p425_p2 }
  0x28   : > { %435 = shalt.err (!%p432_p6)
}
  0x29   : > { %367 = dma.hbm_to_vmem [thread:$0]  (!%p592_p13), %s588_s4, 128, %s596_s6, %s149_s8  }
  0x2a   : > { %p685_p9 = scmp.lt.s32.totalorder %s500_s15, 3  ;;  %p686_p7 = scmp.ge.s32.totalorder %s500_s15, 1 }
  0x2c   : > { %p172_p0 = pnand %p686_p7, %p685_p9 }
  0x2d   : > { %s623_s29 = sand.u32 (!%p172_p0), 1, %s492_s13   ;;  %p687_p6 = scmp.ne.s32.totalorder (!%p172_p0), %s681_s23, 0 }
  0x2e   : > { %175 = sbr.rel (%p172_p0) target bundleno = 204 (0xcc), region = 32  ;;  %s352_s30 = sshll.u32 (!%p172_p0), %s623_s29, 3 }
  0x2f   : > { %s178_s5 = scalar_lea.sflag (!%p172_p0), [#allocation3], %s623_s29  ;;  %s181_s9 = scalar_lea.vmem (!%p172_p0), [#allocation2], %s352_s30 }
  0x33   : > { %479 = dma.done.wait (%p687_p6), %s178_s5, 128  }
  0x34   : > { %481 = vsyncadd (%p687_p6), %s178_s5, 4294967168  ;;  %p212_p11 = scmp.lt.s32.totalorder %s546_s16, 1  ;;  %v503_v0 = vmov 0   ;;  %v229_v5 = vld [vmem:[%s181_s9] sm:$0xff]  ;;  %s357_s19 = sshll.u32 %s546_s16, 7 }
  0x35   : > { %407 = vset.pattern.permute.xlu0 %v503_v0  ;;  %s211_s20 = scalar_lea.vmem [#allocation5], %s352_s30  ;;  %s250_s28 = scalar_lea.hbm %s677_s3, %s357_s19 }
  0x36   : > { %s213_s4 = scalar_select %p212_p11, %s546_s16, 1 }
  0x37   : > { %s252_s22 = sshll.u32 %s211_s20, 4  ;;  %s239_s5 = scalar_lea.sflag [#allocation4], %s623_s29  ;;  %s253_s22 = int_to_ptr.vmem [resolvable:$true] %s252_s22 }
  0x38   : > { %s354_s6 = sshll.u32 %s213_s4, 3  ;;  %s436_s4 = scalar_lea.vmem %s253_s22, 128 }
  0x39   : > { %s219_s10 = scalar_lea.vmem %s676_s2, %s354_s6  ;;  %s215_s17 = scalar_lea.vmem %s674_s0, %s354_s6 }
  0x3a   : > { %v220_v1 = vld [vmem:[%s219_s10] sm:$0xff]  ;;  %p437_p12 = scmp.ne.s32.totalorder %s253_s22, %s436_s4  ;;  %p688_p13 = scmp.ne.s32.totalorder %s682_s24, 0 }
  0x3b   : > { %225 = vperm.xlu0 %407, %v220_v1   ;;  %v221_v2 = vsub.f32 1.0, %v220_v1  ;;  %v222_v4 = vld [vmem:[%s215_s17] sm:$0xff]  ;;  %s504_s9 = smov [#allocation5]  }
  0x3c   : > { %p438_p1 = pnand %p437_p12, %p688_p13  ;;  %s440_s6 = sshll.u32 %s504_s9, 4  ;;  %s441_s6 = int_to_ptr.vmem [resolvable:$false] %s440_s6 }
  0x3d   : > { %s442_s16 = scalar_lea.vmem %s441_s6, 256  ;;  %p443_p5 = scmp.lt.s32.totalorder %s253_s22, %s441_s6 }
  0x3e   : > { %p439_p3 = pneg %p438_p1  ;;  %p444_p8 = scmp.lt.s32.totalorder %s442_s16, %s436_s4 }
  0x3f   : > { %232 = vperm.xlu0 %407, %v221_v2  }
  0x40   : > { %p445_p10 = por %p444_p8, %p443_p5 }
  0x42   : > { %p446_p2 = pnand %p445_p10, %p439_p3 }
  0xb6   : > { %v226_v3 = vpop.permute.xlu0 %225 }
  0xb7   : > { %v228_v7 = vmul.f32 %v226_v3, %v222_v4 }
  0xba   : > { %v233_v6 = vpop.permute.xlu0 %232 }
  0xbb   : > { %v235_v8 = vmul.f32 %v233_v6, %v229_v5 }
  0xbd   : > { %v236_v9 = vadd.f32 %v235_v8, %v228_v7 }
  0xbf   : > { %237 = vst [vmem:[%s211_s20] sm:$0xff] %v236_v9 }
  0xc0   : > { %449 = shalt.err (!%p446_p2)
}
  0xc1   : > { %s450_s30 = scalar_lea.hbm %s250_s28, 128  ;;  %s454_s8 = scalar_lea.hbm %s677_s3, 256 }
  0xc2   : > { %p451_p4 = scmp.ne.s32.totalorder %s250_s28, %s450_s30  ;;  %p455_p0 = scmp.lt.s32.totalorder %s250_s28, %s677_s3 }
  0xc3   : > { %p456_p6 = scmp.lt.s32.totalorder %s454_s8, %s450_s30 }
  0xc4   : > { %p452_p9 = pnand %p451_p4, %p688_p13 }
  0xc5   : > { %p457_p11 = por %p456_p6, %p455_p0 }
  0xc6   : > { %p453_p7 = pneg %p452_p9 }
  0xc8   : > { %p458_p12 = pnand %p457_p11, %p453_p7 }
  0xca   : > { %461 = shalt.err (!%p458_p12)
}
  0xcb   : > { %362 = dma.vmem_to_hbm [thread:$0]  (%p688_p13), %s253_s22, 128, %s250_s28, %s239_s5  }
  0xcc PF: > { %s264_s23 = sand.u32 1, %s488_s12   ;;  %p689_p1 = scmp.ne.s32.totalorder %s683_s25, 0 }
  0xcd   : > { %p690_p3 = scmp.ge.s32.totalorder %s500_s15, 2  ;;  %s265_s17 = scalar_lea.sflag [#allocation4], %s264_s23 }
  0xcf   : > { %p369_p5 = pnand %p690_p3, %p689_p1 }
  0xd1   : > { %p370_p8 = pneg %p369_p5 }
  0xd3   : > { %483 = dma.done.wait (%p370_p8), %s265_s17, 128  }
  0xd4   : > { %485 = vsyncadd (%p370_p8), %s265_s17, 4294967168  ;;  %p16_p10 = scmp.ge.s32.totalorder %s550_s18, 4   ;;  %s691_s12 = smov %s492_s13 }
  0xd5   : > { %s692_s13 = smov %s496_s14  ;;  %s693_s14 = smov %s562_s21 }
  0xd6   : > { %s694_s15 = smov %s550_s18  ;;  %18 = sbr.rel (!%p16_p10) target bundleno = 5 (0x5), region = 83 }
  0xdb   :  { %270 = vsyncpa [#allocation3], 1 }
  0xdc   :  { %272 = vsyncpa [#allocation3 + $0x1], 1 }
  0xdd   :  { %273 = vsyncpa [#allocation4], 1 }
  0xde   :  { %275 = vsyncpa [#allocation4 + $0x1], 1 }

</bundles_post_ra>
